<compile_context>
chip_gen: v6e
topology: v6e:2x2x1
jax: 0.10.0
libtpu: 0.0.40
codegen_flags: <defaults>
</compile_context>

<pallas_src>
import numpy as np
import jax
import jax.numpy as jnp
from jax import lax
from jax.experimental import pallas as pl
from jax.experimental.pallas import tpu as pltpu

OUT_POOL = 7                    # AdaptiveAvgPool2d(7)
OUT_PIX = OUT_POOL * OUT_POOL   # 49


# ----------------------------- pool-matrix construction -----------------------------

def _window_bounds(in_size: int, out_size: int):
    starts = [(i * in_size) // out_size for i in range(out_size)]
    ends = [-(-((i + 1) * in_size) // out_size) for i in range(out_size)]  # ceil
    return starts, ends


def _pool_membership_and_scale(H: int, W: int):
    """0/1 window-membership matrix (H*W, 49) and per-window 1/count scale (49, 1)."""
    hs, he = _window_bounds(H, OUT_POOL)
    ws, we = _window_bounds(W, OUT_POOL)
    M = np.zeros((H * W, OUT_PIX), dtype=np.float32)
    inv = np.zeros((OUT_PIX, 1), dtype=np.float32)
    for i in range(OUT_POOL):
        for j in range(OUT_POOL):
            o = i * OUT_POOL + j
            cnt = (he[i] - hs[i]) * (we[j] - ws[j])
            inv[o, 0] = 1.0 / float(cnt)
            for h in range(hs[i], he[i]):
                M[h * W + ws[j]: h * W + we[j], o] = 1.0
    return M, inv


def _pool_matrix(in_size: int):
    """Torch-style AdaptiveAvgPool matrix (7, in_size) with 1/window weights (f32)."""
    s, e = _window_bounds(in_size, OUT_POOL)
    P = np.zeros((OUT_POOL, in_size), dtype=np.float32)
    for i in range(OUT_POOL):
        P[i, s[i]:e[i]] = 1.0 / float(e[i] - s[i])
    return P


# ------------------------------------- kernel ---------------------------------------

def _pooling_kernel(x_ref, m_ref, wt_ref, b_ref, s_ref, o_ref):
    # x_ref : (1, c_tile, H*W)  f32  -- one batch element, one Cin tile (unit-stride block)
    # m_ref : (H*W, 49)         bf16 -- 0/1 pool-window membership (exact in bf16)
    # wt_ref: (c_tile, Cout)    f32  -- 1x1 conv weight slice, transposed
    # b_ref : (1, Cout)         f32
    # s_ref : (49, 1)           f32  -- per-window 1/count
    # o_ref : (1, 49, Cout)     f32  -- resident accumulator across the Cin-tile axis
    c = pl.program_id(1)

    # Cast f32 -> bf16 on the VPU (hidden under the block DMA), feed the MXU.
    xb = x_ref[0].astype(jnp.bfloat16)                                     # (c_tile, HW)
    # Fused H+W adaptive average pool (un-normalized): exact window sums, f32 accumulate.
    pooled = jnp.dot(xb, m_ref[...], preferred_element_type=jnp.float32)   # (c_tile, 49)
    # Partial 1x1 conv for this Cin tile -> (49, Cout), lane-dense in Cout.
    part = lax.dot_general(
        pooled, wt_ref[...],
        dimension_numbers=(((0,), (0,)), ((), ())),
        preferred_element_type=jnp.float32,
    )

    @pl.when(c == 0)
    def _init():
        o_ref[...] = jnp.zeros_like(o_ref)

    o_ref[...] += part[None]

    @pl.when(c == pl.num_programs(1) - 1)
    def _finalize():
        # Per-window 1/count (exact f32) + bias (pool rows sum to 1, so bias adds once).
        o_ref[...] = o_ref[...] * s_ref[...][None] + b_ref[...][None]


# ------------------------------------ wrapper ---------------------------------------

def _round_up(n: int, m: int) -> int:
    return ((n + m - 1) // m) * m


def _vmem_plan(HW: int, Cout: int):
    """(vmem_limit_bytes, per-buffer byte budget for one x block), chip-aware."""
    try:
        cap = int(pltpu.get_tpu_info().vmem_capacity_bytes)
    except Exception:
        cap = 64 << 20  # conservative fallback (v7x per-core VMEM)
    vmem_limit = max(32 << 20, min(int(cap * 0.72), cap - (16 << 20)))
    lanes49 = _round_up(OUT_PIX, 128)
    # Blocks the pipeline keeps resident (each double-buffered):
    fixed = 2 * _round_up(HW, 8) * lanes49 * 2                               # membership (bf16)
    fixed += 2 * _round_up(OUT_PIX, 8) * _round_up(Cout, 128) * 4            # output block
    fixed += 2 * (8 * _round_up(Cout, 128) * 4 + _round_up(OUT_PIX, 8) * 128 * 4)  # bias+scale
    x_budget = max((vmem_limit - fixed - (4 << 20)) // 2, 1 << 20)           # /2 double-buffer
    return int(vmem_limit), int(x_budget)


def _choose_c_tile(Cin: int, HW: int, Cout: int, budget_bytes: int) -> int:
    # Bytes per channel held per buffer: f32 x row (lane-padded) + f32 conv-weight row.
    per_c = _round_up(HW, 128) * 4 + _round_up(Cout, 128) * 4
    if Cin % 8 != 0 or Cin * per_c <= budget_bytes:
        return Cin  # single tile (also the only legal choice when Cin % 8 != 0)
    best = 8
    for ct in range(8, Cin + 1, 8):
        if Cin % ct == 0 and ct * per_c <= budget_bytes:
            best = ct
    return best


def pooling_forward(x_nchw, weight, bias, *, c_tile=None):
    """x_nchw: (N, Cin, H, W) f32; weight: (Cout, Cin, 1, 1); bias: (Cout,).
    Returns (N, Cout, 7, 7) f32 == AdaptiveAvgPool2d(7)(Conv2d(Cin, Cout, 1)(x))."""
    N, Cin, H, W = x_nchw.shape
    Cout = weight.shape[0]
    HW = H * W

    vmem_limit, x_budget = _vmem_plan(HW, Cout)
    if c_tile is None:
        c_tile = _choose_c_tile(Cin, HW, Cout, x_budget)
    assert Cin % c_tile == 0, "c_tile must divide Cin"
    n_ct = Cin // c_tile

    # Free, contiguous collapse of the two minor dims -> unit-stride block DMAs and a
    # lane-dense (c_tile, H*W) tile inside the kernel.  No wrapper-side dtype cast.
    x3 = jnp.asarray(x_nchw, jnp.float32).reshape(N, Cin, HW)

    m_np, inv_np = _pool_membership_and_scale(H, W)
    m = jnp.asarray(m_np, jnp.bfloat16)                     # 0/1: exact in bf16
    s = jnp.asarray(inv_np, jnp.float32)                    # (49, 1)
    wt = jnp.asarray(weight, jnp.float32)[:, :, 0, 0].T     # (Cin, Cout)
    b = jnp.asarray(bias, jnp.float32).reshape(1, Cout)     # (1, Cout)

    out = pl.pallas_call(
        _pooling_kernel,
        out_shape=jax.ShapeDtypeStruct((N, OUT_PIX, Cout), jnp.float32),
        grid_spec=pltpu.PrefetchScalarGridSpec(
            num_scalar_prefetch=0,
            grid=(N, n_ct),
            in_specs=[
                pl.BlockSpec((1, c_tile, HW), lambda n, c: (n, c, 0)),
                pl.BlockSpec((HW, OUT_PIX), lambda n, c: (0, 0)),
                pl.BlockSpec((c_tile, Cout), lambda n, c: (c, 0)),
                pl.BlockSpec((1, Cout), lambda n, c: (0, 0)),
                pl.BlockSpec((OUT_PIX, 1), lambda n, c: (0, 0)),
            ],
            out_specs=pl.BlockSpec((1, OUT_PIX, Cout), lambda n, c: (n, 0, 0)),
        ),
        compiler_params=pltpu.CompilerParams(
            dimension_semantics=("parallel", "arbitrary"),
            vmem_limit_bytes=vmem_limit,
        ),
    )(x3, m, wt, b, s)

    # Tiny lane-dense -> NCHW relayout outside the kernel.
    return out.reshape(N, OUT_POOL, OUT_POOL, Cout).transpose(0, 3, 1, 2)


# ----------------------------------- reference --------------------------------------

def _reference(x_f32, weight, bias):
    """Pure-JAX reference in the module's order: Conv2d(1x1) then AdaptiveAvgPool2d(7)."""
    _, _, H, W = x_f32.shape
    w = jnp.asarray(weight, jnp.float32)[:, :, 0, 0]
    b = jnp.asarray(bias, jnp.float32)
    y = jnp.einsum('nchw,oc->nohw', x_f32, w) + b[None, :, None, None]
    Pw = jnp.asarray(_pool_matrix(W), jnp.float32)
    Ph = jnp.asarray(_pool_matrix(H), jnp.float32)
    y = jnp.einsum('nohw,jw->nohj', y, Pw)
    return jnp.einsum('nohj,ih->noij', y, Ph)


if __name__ == "__main__":
    key = jax.random.PRNGKey(0)
    k1, k2, k3, k4, k5, k6 = jax.random.split(key, 6)

    # ---- case 1: single Cin tile, uniform 16 -> 7 windows --------------------------
    N, in_c, out_c, H, W = 2, 4, 8, 16, 16
    x = jax.random.normal(k1, (N, in_c, H, W), dtype=jnp.float32)
    weight = jax.random.normal(k2, (out_c, in_c, 1, 1), dtype=jnp.float32) * 0.1
    bias = jax.random.normal(k3, (out_c,), dtype=jnp.float32) * 0.1

    out = jax.block_until_ready(pooling_forward(x, weight, bias))
    assert out.shape == (N, out_c, OUT_POOL, OUT_POOL)
    # Reference applies the same in-kernel bf16 rounding of x, but in the module's
    # conv -> pool order (validates the pool/conv commutation; pool weights are exact).
    x_q = x.astype(jnp.bfloat16).astype(jnp.float32)
    ref = _reference(x_q, weight, bias)
    np.testing.assert_allclose(np.asarray(out), np.asarray(ref), rtol=1e-4, atol=1e-4)

    # ---- case 2: Cin-tiled accumulation path + non-uniform adaptive windows --------
    N2, in_c2, out_c2, H2, W2 = 1, 16, 10, 30, 26
    x2 = jax.random.normal(k4, (N2, in_c2, H2, W2), dtype=jnp.float32)
    w2 = jax.random.normal(k5, (out_c2, in_c2, 1, 1), dtype=jnp.float32) * 0.1
    b2 = jax.random.normal(k6, (out_c2,), dtype=jnp.float32) * 0.1

    out2 = jax.block_until_ready(pooling_forward(x2, w2, b2, c_tile=8))
    assert out2.shape == (N2, out_c2, OUT_POOL, OUT_POOL)
    x2_q = x2.astype(jnp.bfloat16).astype(jnp.float32)
    ref2 = _reference(x2_q, w2, b2)
    np.testing.assert_allclose(np.asarray(out2), np.asarray(ref2), rtol=1e-4, atol=1e-4)

    print("KERNEL_OK")
</pallas_src>

<mosaic_0001>
module attributes {stable_mosaic.version = 11 : i64} {
  func.func @_pooling_kernel(%arg0: i32, %arg1: i32, %arg2: memref<1x4x256xf32, #tpu.memory_space<vmem>>, %arg3: memref<256x49xbf16, #tpu.memory_space<vmem>>, %arg4: memref<4x8xf32, #tpu.memory_space<vmem>>, %arg5: memref<1x8xf32, #tpu.memory_space<vmem>>, %arg6: memref<49x1xf32, #tpu.memory_space<vmem>>, %arg7: memref<1x49x8xf32, #tpu.memory_space<vmem>>) attributes {dimension_semantics = [#tpu.dimension_semantics<parallel>, #tpu.dimension_semantics<arbitrary>], iteration_bounds = array<i64: 2, 1>, scalar_prefetch = 0 : i64, scratch_operands = 0 : i64, tpu.core_type = #tpu.core_type<tc>, window_params = [{transform_indices = @transform_0, window_bounds = array<i64: 1, 4, 256>}, {pipeline_mode = #tpu.pipeline_mode<synchronous>, transform_indices = @transform_1, window_bounds = array<i64: 256, 49>}, {transform_indices = @transform_2, window_bounds = array<i64: 4, 8>}, {pipeline_mode = #tpu.pipeline_mode<synchronous>, transform_indices = @transform_3, window_bounds = array<i64: 1, 8>}, {pipeline_mode = #tpu.pipeline_mode<synchronous>, transform_indices = @transform_4, window_bounds = array<i64: 49, 1>}, {transform_indices = @transform_5, window_bounds = array<i64: 1, 49, 8>}]} {
    %c0 = arith.constant 0 : index
    %c0_0 = arith.constant 0 : index
    %c0_1 = arith.constant 0 : index
    %0 = vector.load %arg2[%c0, %c0_0, %c0_1] : memref<1x4x256xf32, #tpu.memory_space<vmem>>, vector<1x4x256xf32>
    %1 = vector.shape_cast %0 : vector<1x4x256xf32> to vector<4x256xf32>
    %2 = arith.truncf %1 : vector<4x256xf32> to vector<4x256xbf16>
    %c0_2 = arith.constant 0 : index
    %c0_3 = arith.constant 0 : index
    %3 = vector.load %arg3[%c0_2, %c0_3] : memref<256x49xbf16, #tpu.memory_space<vmem>>, vector<256x49xbf16>
    %cst = arith.constant dense<0.000000e+00> : vector<4x49xf32>
    %4 = tpu.matmul %2, %3, %cst {dimension_numbers = #tpu.dot_dimension_numbers<[1], [0], [0], [1], [0, 0, 1, 1], [], []>} : vector<4x256xbf16>, vector<256x49xbf16>, vector<4x49xf32> -> vector<4x49xf32>
    %c0_4 = arith.constant 0 : index
    %c0_5 = arith.constant 0 : index
    %5 = vector.load %arg4[%c0_4, %c0_5] : memref<4x8xf32, #tpu.memory_space<vmem>>, vector<4x8xf32>
    %cst_6 = arith.constant dense<0.000000e+00> : vector<49x8xf32>
    %6 = tpu.matmul %4, %5, %cst_6 {dimension_numbers = #tpu.dot_dimension_numbers<[0], [0], [1], [1], [0, 1, 1, 1], [], []>} : vector<4x49xf32>, vector<4x8xf32>, vector<49x8xf32> -> vector<49x8xf32>
    %c0_i32 = arith.constant 0 : i32
    %7 = arith.cmpi eq, %arg1, %c0_i32 : i32
    %8 = arith.extui %7 : i1 to i32
    %c0_i32_7 = arith.constant 0 : i32
    %9 = arith.cmpi ne, %8, %c0_i32_7 : i32
    scf.if %9 {
      %cst_16 = arith.constant 0.000000e+00 : f32
      %17 = vector.broadcast %cst_16 : f32 to vector<1x49x8xf32>
      %c0_17 = arith.constant 0 : index
      %c0_18 = arith.constant 0 : index
      %c0_19 = arith.constant 0 : index
      %18 = vector.load %arg7[%c0_17, %c0_18, %c0_19] : memref<1x49x8xf32, #tpu.memory_space<vmem>>, vector<1x49x8xf32>
      tpu.vector_store %arg7[%c0_17, %c0_18, %c0_19], %17 {strides = array<i32>} : memref<1x49x8xf32, #tpu.memory_space<vmem>>, vector<1x49x8xf32>,
    } else {
    }
    %c0_8 = arith.constant 0 : index
    %c0_9 = arith.constant 0 : index
    %c0_10 = arith.constant 0 : index
    %10 = vector.load %arg7[%c0_8, %c0_9, %c0_10] : memref<1x49x8xf32, #tpu.memory_space<vmem>>, vector<1x49x8xf32>
    %11 = vector.shape_cast %6 : vector<49x8xf32> to vector<1x49x8xf32>
    %12 = arith.addf %10, %11 : vector<1x49x8xf32>
    %c0_11 = arith.constant 0 : index
    %c0_12 = arith.constant 0 : index
    %c0_13 = arith.constant 0 : index
    %13 = vector.load %arg7[%c0_11, %c0_12, %c0_13] : memref<1x49x8xf32, #tpu.memory_space<vmem>>, vector<1x49x8xf32>
    tpu.vector_store %arg7[%c0_11, %c0_12, %c0_13], %12 {strides = array<i32>} : memref<1x49x8xf32, #tpu.memory_space<vmem>>, vector<1x49x8xf32>,
    %c0_i32_14 = arith.constant 0 : i32
    %14 = arith.cmpi eq, %arg1, %c0_i32_14 : i32
    %15 = arith.extui %14 : i1 to i32
    %c0_i32_15 = arith.constant 0 : i32
    %16 = arith.cmpi ne, %15, %c0_i32_15 : i32
    scf.if %16 {
      %c0_16 = arith.constant 0 : index
      %c0_17 = arith.constant 0 : index
      %c0_18 = arith.constant 0 : index
      %17 = vector.load %arg7[%c0_16, %c0_17, %c0_18] : memref<1x49x8xf32, #tpu.memory_space<vmem>>, vector<1x49x8xf32>
      %c0_19 = arith.constant 0 : index
      %c0_20 = arith.constant 0 : index
      %18 = vector.load %arg6[%c0_19, %c0_20] : memref<49x1xf32, #tpu.memory_space<vmem>>, vector<49x1xf32>
      %19 = vector.shape_cast %18 : vector<49x1xf32> to vector<1x49x1xf32>
      %20 = vector.broadcast %19 : vector<1x49x1xf32> to vector<1x49x8xf32>
      %21 = arith.mulf %17, %20 : vector<1x49x8xf32>
      %c0_21 = arith.constant 0 : index
      %c0_22 = arith.constant 0 : index
      %22 = vector.load %arg5[%c0_21, %c0_22] : memref<1x8xf32, #tpu.memory_space<vmem>>, vector<1x8xf32>
      %23 = vector.shape_cast %22 : vector<1x8xf32> to vector<1x1x8xf32>
      %24 = vector.broadcast %23 : vector<1x1x8xf32> to vector<1x49x8xf32>
      %25 = arith.addf %21, %24 : vector<1x49x8xf32>
      %c0_23 = arith.constant 0 : index
      %c0_24 = arith.constant 0 : index
      %c0_25 = arith.constant 0 : index
      %26 = vector.load %arg7[%c0_23, %c0_24, %c0_25] : memref<1x49x8xf32, #tpu.memory_space<vmem>>, vector<1x49x8xf32>
      tpu.vector_store %arg7[%c0_23, %c0_24, %c0_25], %25 {strides = array<i32>} : memref<1x49x8xf32, #tpu.memory_space<vmem>>, vector<1x49x8xf32>,
    } else {
    }
    return
  }
  func.func @transform_0(%arg0: i32, %arg1: i32) -> (i32, i32, i32) {
    %c0_i32 = arith.constant 0 : i32
    %c0_i32_0 = arith.constant 0 : i32
    return %arg0, %arg1, %c0_i32 : i32, i32, i32
  }
  func.func @transform_1(%arg0: i32, %arg1: i32) -> (i32, i32) {
    %c0_i32 = arith.constant 0 : i32
    %c0_i32_0 = arith.constant 0 : i32
    %c0_i32_1 = arith.constant 0 : i32
    return %c0_i32, %c0_i32_0 : i32, i32
  }
  func.func @transform_2(%arg0: i32, %arg1: i32) -> (i32, i32) {
    %c0_i32 = arith.constant 0 : i32
    %c0_i32_0 = arith.constant 0 : i32
    return %arg1, %c0_i32 : i32, i32
  }
  func.func @transform_3(%arg0: i32, %arg1: i32) -> (i32, i32) {
    %c0_i32 = arith.constant 0 : i32
    %c0_i32_0 = arith.constant 0 : i32
    %c0_i32_1 = arith.constant 0 : i32
    return %c0_i32, %c0_i32_0 : i32, i32
  }
  func.func @transform_4(%arg0: i32, %arg1: i32) -> (i32, i32) {
    %c0_i32 = arith.constant 0 : i32
    %c0_i32_0 = arith.constant 0 : i32
    %c0_i32_1 = arith.constant 0 : i32
    return %c0_i32, %c0_i32_0 : i32, i32
  }
  func.func @transform_5(%arg0: i32, %arg1: i32) -> (i32, i32, i32) {
    %c0_i32 = arith.constant 0 : i32
    %c0_i32_0 = arith.constant 0 : i32
    %c0_i32_1 = arith.constant 0 : i32
    return %arg0, %c0_i32, %c0_i32_0 : i32, i32, i32
  }
}

</mosaic_0001>

<bundles_post_ra>
// kernel: tpu_custom_call.1
= control target key start
LH: loop header
LB: loop body
LE: loop exit
PB: predicated region body
PF: predicated region fallthrough
CT: control target
= control target key end

     0   :  { %s1000_s18 = smov 0   ;;  %s1002_s19 = smov 0   ;;  %s1184_s0 = inlined_call_operand.vmem [shape: f32[2,4,256], index: 0, kind: input, shape index: {}]   ;;  %s1185_s1 = inlined_call_operand.vmem [shape: bf16[256,49], index: 1, kind: input, shape index: {}]   ;;  %s1186_s2 = inlined_call_operand.vmem [shape: f32[4,8], index: 2, kind: input, shape index: {}]   ;;  %s1187_s3 = inlined_call_operand.vmem [shape: f32[1,8], index: 3, kind: input, shape index: {}]   ;;  %s1188_s4 = inlined_call_operand.vmem [shape: f32[49,1], index: 4, kind: input, shape index: {}]   ;;  %s1189_s5 = inlined_call_operand.vmem [shape: f32[2,49,8], index: 5, kind: output, shape index: {}]  }
   0x1   :  { %s1004_s20 = smov 0  }
   0x2 LB: > { %s27_s21 = sadd.s32 1, %s961_s19  ;;  %p811_p0 = scmp.ge.s32.totalorder %s965_s20, 1  ;;  %s965_s20 = sphi %s1004_s20, %s15_s20   ;;  %s961_s19 = sphi %s1002_s19, %s1191_s19   ;;  %s957_s18 = sphi %s1000_s18, %s1190_s18  }
   0x3   : > { %p29_p1 = scmp.ge.s32.totalorder %s27_s21, 2  ;;  %p214_p2 = scmp.lt.s32.totalorder %s965_s20, 3 }
   0x5   : > { %s1193_s21 = smov (%p29_p1, %s27_s21), 0  ;;  %p215_p3 = pnand %p811_p0, %p214_p2 }
   0x6   : > { %p250_p4 = scmp.lt.s32.totalorder (!%p215_p3), %s957_s18, 1 }
   0x7   : > { %218 = sbr.rel (%p215_p3) target bundleno = 600 (0x258), region = 40 }
   0xc   : > { %v926_v0 = vld [vmem:[%s1185_s1 + $0x78] sm:$0xff]   ;;  %v928_v2 = vld [vmem:[%s1185_s1 + $0x70] sm:$0xff]   ;;  %v930_v4 = vld [vmem:[%s1185_s1 + $0x68] sm:$0xff]   ;;  %s1195_s18 = smov (!%p250_p4, %s957_s18), 1  ;;  %vm498_vm0 = vcmask 1043456   ;;  %v967_v21 = vmov 0.0  }
   0xd   : > { %v927_v1 = vld [vmem:[%s1185_s1 + $0x38] sm:$0xff]   ;;  %843 = vmatprep.subr.bf16.mxu0 %v926_v0  ;;  %v929_v3 = vld [vmem:[%s1185_s1 + $0x30] sm:$0xff]   ;;  %v931_v5 = vld [vmem:[%s1185_s1 + $0x28] sm:$0xff]   ;;  %s842_s11 = sshll.u32 %s1195_s18, 3  ;;  %873 = vmatprep.subr.mxu1 %v967_v21  ;;  %vm968_vm1 = vmmov 0   ;;  %v969_v28 = vmov 0  }
   0xe   : > { %844 = vmatpush3.bf16.msra.mxu0 %v927_v1  ;;  %v932_v6 = vld [vmem:[%s1185_s1 + $0x60] sm:$0xff]   ;;  %v934_v8 = vld [vmem:[%s1185_s1 + $0x58] sm:$0xff]   ;;  %s258_s22 = scalar_lea.vmem %s1184_s0, %s842_s11  ;;  %v936_v10 = vld [vmem:[%s1185_s1 + $0x50] sm:$0xff]   ;;  %875 = vmatprep.mubr.msk.f32.mxu1 %vm968_vm1, %v967_v21  ;;  %vm476_vm2 = vcmask 31744   ;;  %s896_s7 = smul.u32 56, %s1195_s18  ;;  %vm606_vm3 = vcmask 64512  }
   0xf   : > { %845 = vmatprep.subr.bf16.mxu0 %v928_v2  ;;  %v933_v7 = vld [vmem:[%s1185_s1 + $0x20] sm:$0xff]   ;;  %v935_v9 = vld [vmem:[%s1185_s1 + $0x18] sm:$0xff]   ;;  %v937_v13 = vld [vmem:[%s1185_s1 + $0x10] sm:$0xff]   ;;  %925 = vset.pattern.permute.xlu1 %v969_v28  ;;  %vm613_vm4 = vcmask 57344  }
  0x10   : > { %v269_v11 = vld [vmem:[%s258_s22] sm:$0xff]  ;;  %v938_v15 = vld [vmem:[%s1185_s1 + $0x48] sm:$0xff]   ;;  %v650_v29 = vld [vmem:[%s1188_s4 + $0x10] sm:$0xff]  ;;  %s1114_s10 = scalar_lea.vmem %s1189_s5, %s896_s7 }
  0x11   : > { %v271_v12 = vcombine.high %v269_v11, %v269_v11  ;;  %v939_v16 = vld [vmem:[%s1185_s1 + $0x8] sm:$0xff]   ;;  %v940_v17 = vld [vmem:[%s1185_s1 + $0x40] sm:$0xff]   ;;  %v273_v19 = vpack.c.bf16 %v269_v11, %v269_v11  ;;  %v651_v30 = vld [vmem:[%s1188_s4 + $0x18] sm:$0xff]  ;;  %607 = vst.msk [vmem:[%s1114_s10] sm:$0xff] %vm606_vm3, %v967_v21 }
  0x12   : > { %846 = vmatpush3.bf16.msra.mxu0 %v929_v3  ;;  %v941_v18 = vld [vmem:[%s1185_s1] sm:$0xff]   ;;  %v649_v27 = vld [vmem:[%s1188_s4 + $0x8] sm:$0xff]  ;;  %v654_v33 = vld [vmem:[%s1188_s4 + $0x30] sm:$0x1]  ;;  %608 = vst.msk [vmem:[%s1114_s10 + $0x8] sm:$0xff] %vm606_vm3, %v967_v21 }
  0x13   : > { %847 = vmatprep.subr.bf16.mxu0 %v930_v4  ;;  %v274_v14 = vpack.c.bf16 %v271_v12, %v271_v12  ;;  %v443_v20 = vld [vmem:[%s1186_s2] sm:$0xf]  ;;  %662 = vperm.xlu1 %925, %v649_v27   ;;  %v653_v32 = vld [vmem:[%s1188_s4 + $0x28] sm:$0xff]  ;;  %609 = vst.msk [vmem:[%s1114_s10 + $0x10] sm:$0xff] %vm606_vm3, %v967_v21  ;;  %610 = vst.msk [vmem:[%s1114_s10 + $0x18] sm:$0xff] %vm606_vm3, %v967_v21 }
  0x14   : > { %874 = vmatpush3.msk.msra.mxu1 %vm498_vm0, %v443_v20  ;;  %v652_v31 = vld [vmem:[%s1188_s4 + $0x20] sm:$0xff]  ;;  %611 = vst.msk [vmem:[%s1114_s10 + $0x20] sm:$0xff] %vm606_vm3, %v967_v21  ;;  %612 = vst.msk [vmem:[%s1114_s10 + $0x28] sm:$0xff] %vm606_vm3, %v967_v21 }
  0x15   : > { %435 = vmatprep.mubr.bf16.mxu0 %v274_v14  ;;  %v648_v34 = vld [vmem:[%s1188_s4] sm:$0xff]  ;;  %614 = vst.msk [vmem:[%s1114_s10 + $0x30] sm:$0x1] %vm613_vm4, %v967_v21 }
  0x16   : > { %848 = vmatpush3.bf16.msra.mxu0 %v931_v5  ;;  %v839_v56 = vld [vmem:[%s1187_s3] ss:$0 sm:$0xff] }
  0x17   : > { %849 = vmatprep.subr.bf16.mxu0 %v932_v6  ;;  %667 = vperm.xlu1 %925, %v650_v29  }
  0x18   : > { %v615_v42 = vld [vmem:[%s1114_s10] sm:$0xff] }
  0x19   : > { %v616_v46 = vld [vmem:[%s1114_s10 + $0x8] sm:$0xff] }
  0x1a   : > { %850 = vmatpush3.bf16.msra.mxu0 %v933_v7  ;;  %v617_v51 = vld [vmem:[%s1114_s10 + $0x10] sm:$0xff]  ;;  %v618_v59 = vld [vmem:[%s1114_s10 + $0x18] sm:$0xff] }
  0x1b   : > { %851 = vmatprep.subr.bf16.mxu0 %v934_v8  ;;  %672 = vperm.xlu1 %925, %v651_v30   ;;  %v619_v2 = vld [vmem:[%s1114_s10 + $0x20] sm:$0xff] }
  0x1e   : > { %852 = vmatpush3.bf16.msra.mxu0 %v935_v9 }
  0x1f   : > { %853 = vmatprep.subr.bf16.mxu0 %v936_v10  ;;  %677 = vperm.xlu1 %925, %v652_v31   ;;  %v620_v10 = vld [vmem:[%s1114_s10 + $0x28] sm:$0xff] }
  0x22   : > { %854 = vmatpush3.bf16.msra.mxu0 %v937_v13 }
  0x23   : > { %855 = vmatprep.subr.bf16.mxu0 %v938_v15  ;;  %682 = vperm.xlu1 %925, %v653_v32  }
  0x26   : > { %856 = vmatpush3.bf16.msra.mxu0 %v939_v16 }
  0x27   : > { %857 = vmatprep.subr.bf16.mxu0 %v940_v17  ;;  %687 = vperm.xlu1 %925, %v654_v33  }
  0x2a   : > { %858 = vmatpush3.bf16.msra.mxu0 %v941_v18  ;;  %v621_v18 = vld [vmem:[%s1114_s10 + $0x30] sm:$0x1] }
  0x2d   : > { %436 = vmatmul.mubr.bf16.vlgmr.msra.gmra.mxu0 %v273_v19 }
  0x8e   : > { %v663_v47 = vpop.permute.xlu1 %662 }
  0x92   : > { %v668_v55 = vpop.permute.xlu1 %667 }
  0x96   : > { %v673_v4 = vpop.permute.xlu1 %672 }
  0x9a   : > { %v678_v15 = vpop.permute.xlu1 %677 }
  0xed   : > { %v859_v22 = vpop.f32.mrf.mxu0 }
  0xef   : > { %v860_v23 = vpop.f32.mrf.mxu0 }
  0xf0   : > { %v861_v24 = vadd.f32 %v860_v23, %v859_v22 }
  0xf1   : > { %v862_v25 = vpop.f32.mrf.mxu0 }
  0xf2   : > { %444 = vxpose.xlu0.b32.start.end [1/1] (short) (narrow) %v861_v24, 56 }
  0xf3   : > { %v863_v26 = vpop.f32.mrf.mxu0 }
  0xf4   : > { %v683_v26 = vpop.permute.xlu1 %682 }
  0xf8   : > { %v688_v31 = vpop.permute.xlu1 %687 }
 0x11b   : > { %924 = vset.pattern.permute.xlu0 %v969_v28 }
 0x133   : > { %657 = vperm.xlu0 %924, %v648_v34  }
 0x16e   : > { %v460_v35 = vpop.trf.xlu0 }
 0x16f   : > { %876 = vmatmul.mubr.msk.f32.vlgmr.msra.gmra.mxu1 %vm476_vm2, %v460_v35 }
 0x170   : > { %878 = vmatprep.mubr.msk.f32.mxu1 %vm968_vm1, %v967_v21 }
 0x172   : > { %v461_v36 = vpop.trf.xlu0 }
 0x173   : > { %879 = vmatmul.mubr.msk.f32.gmra.mxu1 %vm476_vm2, %v461_v36 }
 0x174   : > { %881 = vmatprep.mubr.msk.f32.mxu1 %vm968_vm1, %v967_v21 }
 0x176   : > { %v462_v37 = vpop.trf.xlu0 }
 0x177   : > { %882 = vmatmul.mubr.msk.f32.gmra.mxu1 %vm476_vm2, %v462_v37 }
 0x178   : > { %884 = vmatprep.mubr.msk.f32.mxu1 %vm968_vm1, %v967_v21 }
 0x17a   : > { %v463_v38 = vpop.trf.xlu0 }
 0x17b   : > { %885 = vmatmul.mubr.msk.f32.gmra.mxu1 %vm476_vm2, %v463_v38 }
 0x17c   : > { %887 = vmatprep.mubr.msk.f32.mxu1 %vm968_vm1, %v967_v21 }
 0x17e   : > { %v464_v39 = vpop.trf.xlu0 }
 0x17f   : > { %888 = vmatmul.mubr.msk.f32.gmra.mxu1 %vm476_vm2, %v464_v39 }
 0x180   : > { %890 = vmatprep.mubr.msk.f32.mxu1 %vm968_vm1, %v967_v21 }
 0x182   : > { %v465_v40 = vpop.trf.xlu0 }
 0x183   : > { %891 = vmatmul.mubr.msk.f32.gmra.mxu1 %vm476_vm2, %v465_v40 }
 0x184   : > { %893 = vmatprep.mubr.msk.f32.mxu1 %vm968_vm1, %v967_v21 }
 0x186   : > { %v466_v41 = vpop.trf.xlu0 }
 0x187   : > { %894 = vmatmul.mubr.msk.f32.gmra.mxu1 %vm476_vm2, %v466_v41 }
 0x1ae   : > { %v658_v53 = vpop.permute.xlu0 %657 }
 0x22f   : > { %v568_v43 = vpop.f32.mrf.mxu1 }
 0x230   : > { %v622_v44 = vadd.f32 %v615_v42, %v568_v43 }
 0x231   : > { %v877_v45 = vpop.f32.mrf.mxu1 }
 0x232   : > { %630 = vst.msk [vmem:[%s1114_s10] sm:$0xff] %vm606_vm3, %v622_v44 }
 0x233   : > { %v573_v48 = vpop.f32.mrf.mxu1 }
 0x234   : > { %v623_v49 = vadd.f32 %v616_v46, %v573_v48 }
 0x235   : > { %v880_v50 = vpop.f32.mrf.mxu1 }
 0x236   : > { %631 = vst.msk [vmem:[%s1114_s10 + $0x8] sm:$0xff] %vm606_vm3, %v623_v49 }
 0x237   : > { %v578_v52 = vpop.f32.mrf.mxu1 }
 0x238   : > { %v624_v54 = vadd.f32 %v617_v51, %v578_v52 }
 0x239   : > { %v883_v57 = vpop.f32.mrf.mxu1  ;;  %v641_v58 = vld [vmem:[%s1114_s10] sm:$0xff] }
 0x23a   : > { %632 = vst.msk [vmem:[%s1114_s10 + $0x10] sm:$0xff] %vm606_vm3, %v624_v54  ;;  %v690_v60 = vmul.f32 %v658_v53, %v641_v58 }
 0x23b   : > { %v583_v61 = vpop.f32.mrf.mxu1 }
 0x23c   : > { %v704_v62 = vadd.f32 %v839_v56, %v690_v60  ;;  %v625_v63 = vadd.f32 %v618_v59, %v583_v61 }
 0x23d   : > { %v642_v0 = vld [vmem:[%s1114_s10 + $0x8] sm:$0xff]  ;;  %v886_v1 = vpop.f32.mrf.mxu1 }
 0x23e   : > { %v691_v3 = vmul.f32 %v663_v47, %v642_v0  ;;  %711 = vst.msk [vmem:[%s1114_s10] sm:$0xff] %vm606_vm3, %v704_v62  ;;  %633 = vst.msk [vmem:[%s1114_s10 + $0x18] sm:$0xff] %vm606_vm3, %v625_v63 }
 0x23f   : > { %v588_v5 = vpop.f32.mrf.mxu1 }
 0x240   : > { %v705_v6 = vadd.f32 %v839_v56, %v691_v3  ;;  %v626_v7 = vadd.f32 %v619_v2, %v588_v5 }
 0x241   : > { %v643_v8 = vld [vmem:[%s1114_s10 + $0x10] sm:$0xff]  ;;  %v889_v9 = vpop.f32.mrf.mxu1 }
 0x242   : > { %712 = vst.msk [vmem:[%s1114_s10 + $0x8] sm:$0xff] %vm606_vm3, %v705_v6  ;;  %v692_v11 = vmul.f32 %v668_v55, %v643_v8  ;;  %634 = vst.msk [vmem:[%s1114_s10 + $0x20] sm:$0xff] %vm606_vm3, %v626_v7 }
 0x243   : > { %v593_v12 = vpop.f32.mrf.mxu1 }
 0x244   : > { %v706_v13 = vadd.f32 %v839_v56, %v692_v11  ;;  %v627_v14 = vadd.f32 %v620_v10, %v593_v12 }
 0x245   : > { %v644_v16 = vld [vmem:[%s1114_s10 + $0x18] sm:$0xff]  ;;  %v892_v17 = vpop.f32.mrf.mxu1 }
 0x246   : > { %713 = vst.msk [vmem:[%s1114_s10 + $0x10] sm:$0xff] %vm606_vm3, %v706_v13  ;;  %v693_v19 = vmul.f32 %v673_v4, %v644_v16  ;;  %635 = vst.msk [vmem:[%s1114_s10 + $0x28] sm:$0xff] %vm606_vm3, %v627_v14 }
 0x247   : > { %v598_v20 = vpop.f32.mrf.mxu1 }
 0x248   : > { %v707_v21 = vadd.f32 %v839_v56, %v693_v19  ;;  %v628_v22 = vadd.f32 %v621_v18, %v598_v20 }
 0x249   : > { %v645_v23 = vld [vmem:[%s1114_s10 + $0x20] sm:$0xff]  ;;  %v895_v24 = vpop.f32.mrf.mxu1 }
 0x24a   : > { %714 = vst.msk [vmem:[%s1114_s10 + $0x18] sm:$0xff] %vm606_vm3, %v707_v21  ;;  %v694_v25 = vmul.f32 %v678_v15, %v645_v23 }
 0x24b   : > { %637 = vst.msk [vmem:[%s1114_s10 + $0x30] sm:$0x1] %vm613_vm4, %v628_v22 }
 0x24c   : > { %v708_v27 = vadd.f32 %v839_v56, %v694_v25 }
 0x24d   : > { %v646_v28 = vld [vmem:[%s1114_s10 + $0x28] sm:$0xff] }
 0x24e   : > { %715 = vst.msk [vmem:[%s1114_s10 + $0x20] sm:$0xff] %vm606_vm3, %v708_v27  ;;  %v695_v29 = vmul.f32 %v683_v26, %v646_v28 }
 0x250   : > { %v709_v30 = vadd.f32 %v839_v56, %v695_v29 }
 0x252   : > { %v647_v32 = vld [vmem:[%s1114_s10 + $0x30] sm:$0x1]  ;;  %716 = vst.msk [vmem:[%s1114_s10 + $0x28] sm:$0xff] %vm606_vm3, %v709_v30 }
 0x253   : > { %v696_v33 = vmul.f32 %v688_v31, %v647_v32 }
 0x255   : > { %v710_v34 = vadd.f32 %v839_v56, %v696_v33 }
 0x257   : > { %717 = vst.msk [vmem:[%s1114_s10 + $0x30] sm:$0x1] %vm613_vm4, %v710_v34 }
 0x258 PF: > { %s15_s20 = sadd.s32 1, %s965_s20   ;;  %s1190_s18 = smov %s961_s19 }
 0x259   : > { %p12_p5 = scmp.ge.s32.totalorder %s15_s20, 4   ;;  %s1191_s19 = smov %s1193_s21 }
 0x25b   :  { %14 = sbr.rel (!%p12_p5) target bundleno = 2 (0x2), region = 81 }

</bundles_post_ra>
